<compile_context>
chip_gen: v7x
topology: tpu7x:2x2x1
jax: 0.10.0
libtpu: 0.0.40
codegen_flags: <defaults>
</compile_context>

<pallas_src>
import jax
import jax.numpy as jnp
from jax import lax
from jax.experimental import pallas as pl
from jax.experimental.pallas import tpu as pltpu

INIT_SCALE = 0.01


def _mm(a_bf16, b_bf16, contract=((1,), (0,))):
    """bf16 MXU matmul with f32 accumulation."""
    return lax.dot_general(a_bf16, b_bf16, (contract, ((), ())),
                           preferred_element_type=jnp.float32)


def make_kernel(num_heads, head_width, seq_len):
    H, W, S = num_heads, head_width, seq_len
    HW = H * W

    def kernel(x_ref, wqkv_ref, scales_ref, wg_ref, wo_ref, out_ref, o23_ref):
        # ---- fused Q/K/V projection (block-diagonal bf16 weights): one GEMM
        x = x_ref[0].astype(jnp.bfloat16)                       # (S, HW)
        qkv = _mm(x, wqkv_ref[...])                              # (S, 3*HW) f32
        q0 = qkv[:, :HW]
        k0 = qkv[:, HW:2 * HW]
        v0 = qkv[:, 2 * HW:]

        # ---- batch-invariant xPos/decay row scales, precomputed in wrapper.
        # rows: [dq*cos ; dq*sin ; dk*cos ; dk*sin], dq = gamma^(c-shift)/scale,
        # dk = gamma^(shift-d), so the (S,S) decay matrix is never materialized.
        qcos = scales_ref[0 * S:1 * S]
        qsin = scales_ref[1 * S:2 * S]
        kcos = scales_ref[2 * S:3 * S]
        ksin = scales_ref[3 * S:4 * S]

        q_re = q0 * qcos                    # Q = Q0 * exp(+i c theta), decay folded
        q_im = q0 * qsin
        k_re = k0 * kcos                    # K = K0 * exp(-i d theta) = k_re - i*k_im
        k_im = k0 * ksin

        # cast MXU operands to bf16 once, before the per-head loop (item 3)
        QL = jnp.concatenate([q_re, q_im], axis=0).astype(jnp.bfloat16)   # (2S, HW)
        QR = jnp.concatenate([q_im, -q_re], axis=0).astype(jnp.bfloat16)  # (2S, HW)
        KR = k_re.astype(jnp.bfloat16)                                    # (S, HW)
        KI = k_im.astype(jnp.bfloat16)                                    # (S, HW)
        v = v0.astype(jnp.bfloat16)                                       # (S, HW)

        # causal mask in the (2S, S) stacked layout (cheap VPU iota/select; the
        # decay is already in the row scales so masked entries are exact zeros)
        ri = lax.broadcasted_iota(jnp.int32, (2 * S, S), 0)
        ci = lax.broadcasted_iota(jnp.int32, (2 * S, S), 1)
        row = jnp.where(ri >= S, ri - S, ri)
        mask2 = row >= ci

        # ---- per-head retention (block-diagonal in heads).
        # Complex score = ONE GEMM per head (item 1), contraction on lane dims
        # so no explicit K transpose (item 10).  Results land in a VMEM scratch
        # at lane offset h*W (item 8).
        for h in range(H):
            sl = slice(h * W, (h + 1) * W)
            q_cat = jnp.concatenate([QL[:, sl], QR[:, sl]], axis=1)       # (2S, 2W)
            k_cat = jnp.concatenate([KR[:, sl], KI[:, sl]], axis=1)       # (S, 2W)
            # [[q_re|q_im],[q_im|-q_re]] . [k_re|k_im]^T = [sc_re ; sc_im]
            sc = _mm(q_cat, k_cat, contract=((1,), (1,)))                 # (2S, S) f32
            sc = jnp.where(mask2, sc, 0.0)

            o1 = _mm(sc.astype(jnp.bfloat16), v[:, sl])                   # (2S, W) [re;im]

            # L2 normalization over the head dim (no epsilon: matches torch.norm)
            ss = jnp.sum(o1 * o1, axis=-1, keepdims=True)                 # (2S, 1)
            inv = lax.rsqrt(ss[:S] + ss[S:])                              # (S, 1)
            o23_ref[:, sl] = o1 * jnp.concatenate([inv, inv], axis=0)

        o23 = o23_ref[...]                                                # (2S, HW) f32

        # ---- gating: one full-width GEMM for both planes
        g = _mm(o23.astype(jnp.bfloat16), wg_ref[...])                    # (2S, HW) f32
        g_re, g_im = g[:S], g[S:]

        # complex "silu": s = g / (1 + exp(-2 g))
        e = jnp.exp(-2.0 * g_re)
        den_re = 1.0 + e * jnp.cos(2.0 * g_im)
        den_im = -e * jnp.sin(2.0 * g_im)
        inv_den2 = pl.reciprocal(den_re * den_re + den_im * den_im, approx=True)
        s_re = (g_re * den_re + g_im * den_im) * inv_den2
        s_im = (g_im * den_re - g_re * den_im) * inv_den2

        o2_re, o2_im = o23[:S], o23[S:]
        o3 = jnp.concatenate([o2_re * s_re - o2_im * s_im,
                              o2_re * s_im + o2_im * s_re], axis=0)       # (2S, HW)

        # ---- output projection + sublane-stacked store (item 4: no lane concat)
        out_ref[0] = _mm(o3.astype(jnp.bfloat16), wo_ref[...])            # (2S, HW)

    return kernel


def _block_diag(w):
    """(H, W, W) -> (H*W, H*W) block-diagonal (wrapper-side layout glue)."""
    H, W, _ = w.shape
    out = jnp.zeros((H * W, H * W), w.dtype)
    for h in range(H):
        out = out.at[h * W:(h + 1) * W, h * W:(h + 1) * W].set(w[h])
    return out


def gated_msr_forward(x, params):
    B, S, HW = x.shape
    H = params["num_heads"]
    W = params["head_width"]
    assert HW == H * W
    qk_scale = float(W ** 0.5)
    shift = 0.5 * (S - 1)   # center decay exponents: gamma^(c-shift) * gamma^(shift-d)

    # ---- weight preprocessing (layout glue + bf16 cast, item 3).
    # Block-diagonal fused QKV is the right choice for tiny W (<64); for W>=128
    # use per-head batched projection instead (item 2).
    w_qkv = jnp.concatenate([_block_diag(params["W_Q"]),
                             _block_diag(params["W_K"]),
                             _block_diag(params["W_V"])],
                            axis=1).astype(jnp.bfloat16)                 # (HW, 3*HW)
    wg = params["W_G"].reshape(HW, HW).astype(jnp.bfloat16)
    wo = params["W_O"].reshape(HW, HW).astype(jnp.bfloat16)

    # ---- batch-invariant xPos/decay tables, computed once (items 5, 6):
    pos = jnp.arange(S, dtype=jnp.float32)[:, None]                       # (S, 1)
    log_gamma = jnp.repeat(jnp.log(params["gamma"]), W)[None, :]          # (1, HW)
    theta = params["theta"].reshape(1, HW)
    dq = jnp.exp((pos - shift) * log_gamma) * (1.0 / qk_scale)            # (S, HW)
    dk = jnp.exp((shift - pos) * log_gamma)
    ang = pos * theta
    cth = jnp.cos(ang)
    sth = jnp.sin(ang)
    scales = jnp.concatenate([dq * cth, dq * sth, dk * cth, dk * sth],
                             axis=0).astype(jnp.float32)                  # (4S, HW)

    kernel = make_kernel(H, W, S)
    const_map = lambda b: (0, 0)

    packed = pl.pallas_call(
        kernel,
        grid=(B,),
        in_specs=[
            pl.BlockSpec((1, S, HW), lambda b: (b, 0, 0)),     # x
            pl.BlockSpec((HW, 3 * HW), const_map),             # block-diag W_QKV (bf16)
            pl.BlockSpec((4 * S, HW), const_map),              # xPos/decay row scales
            pl.BlockSpec((HW, HW), const_map),                 # W_G flat (bf16)
            pl.BlockSpec((HW, HW), const_map),                 # W_O flat (bf16)
        ],
        out_specs=pl.BlockSpec((1, 2 * S, HW), lambda b: (b, 0, 0)),
        out_shape=jax.ShapeDtypeStruct((B, 2 * S, HW), jnp.float32),
        scratch_shapes=[pltpu.VMEM((2 * S, HW), jnp.float32)],            # o23 (item 8)
        compiler_params=pltpu.CompilerParams(dimension_semantics=("parallel",)),
    )(x, w_qkv, scales, wg, wo)

    # sublane-stacked [real ; imag] -> complex64 (cheap XLA slices)
    return lax.complex(packed[:, :S, :], packed[:, S:, :])


def init_params(key, num_heads, head_width):
    kq, kk, kv, kth, ko, kg = jax.random.split(key, 6)
    H, W = num_heads, head_width
    params = {
        "num_heads": H,
        "head_width": W,
        "W_Q": jax.random.normal(kq, (H, W, W), jnp.float32) * INIT_SCALE,
        "W_K": jax.random.normal(kk, (H, W, W), jnp.float32) * INIT_SCALE,
        "W_V": jax.random.normal(kv, (H, W, W), jnp.float32) * INIT_SCALE,
        "theta": jax.random.normal(kth, (H, W), jnp.float32) * INIT_SCALE,
        "W_O": jax.random.normal(ko, (H, W, H * W), jnp.float32) * INIT_SCALE,
        "W_G": jax.random.normal(kg, (H, W, H, W), jnp.float32) * INIT_SCALE,
        # target_norm is a module parameter but its use in forward() is dead
        # code (the einsum result is immediately overwritten), so it does not
        # affect the output.
        "target_norm": jnp.ones((H,), jnp.float32),
    }
    min_p, max_p = -6, -2
    if H == 1:
        gamma = jnp.array([1.0 - 10.0 ** min_p], jnp.float32)
    else:
        log_range = jnp.arange(H, dtype=jnp.float32) / (H - 1)
        inv_p = min_p + (max_p - min_p) * log_range
        gamma = (1.0 - 10.0 ** inv_p).astype(jnp.float32)
    params["gamma"] = gamma
    return params


def reference_forward(x, params):
    """Plain-JAX complex64 mirror of the PyTorch forward (for validation)."""
    H, W = params["num_heads"], params["head_width"]
    B, S, HW = x.shape
    qk_scale = W ** 0.5
    gamma = params["gamma"]
    pos = jnp.arange(S, dtype=jnp.float32)
    power = pos[:, None] - pos[None, :]
    mask = power >= 0
    D = jnp.where(mask[None], gamma[:, None, None] ** power[None], 0.0)  # (H,S,S)
    Theta = jnp.exp(1j * (pos[None, :, None] * params["theta"][:, None, :]
                          ).astype(jnp.complex64))                       # (H,S,W)
    xh = x.reshape(B, S, H, W).astype(jnp.complex64)
    WQ = params["W_Q"].astype(jnp.complex64)
    WK = params["W_K"].astype(jnp.complex64)
    WV = params["W_V"].astype(jnp.complex64)
    WG = params["W_G"].astype(jnp.complex64)
    WO = params["W_O"].astype(jnp.complex64)
    Q = jnp.einsum("hij,bchi->bhcj", WQ, xh) * Theta
    K = jnp.einsum("hij,bchi->bhcj", WK, xh) * jnp.conj(Theta)
    V = jnp.einsum("hij,bchi->bhcj", WV, xh)
    QK = jnp.einsum("bhci,bhdi->bhcd", Q, K) / qk_scale
    QKD = QK * D[None].astype(jnp.complex64)
    oh = jnp.einsum("bhcd,bhdi->bchi", QKD, V)
    norm = jnp.sqrt(jnp.sum(jnp.abs(oh) ** 2, axis=-1, keepdims=True))
    oh = oh / norm
    gating = jnp.einsum("bchi,hijk->bcjk", oh, WG)
    oh = oh * gating / (1.0 + jnp.exp(-2.0 * gating))
    return jnp.einsum("bchi,hik->bck", oh, WO)


if __name__ == "__main__":
    B, S, H, W = 2, 8, 2, 16            # batch, seq, num_heads, head_width
    key = jax.random.PRNGKey(0)
    kx, kp = jax.random.split(key)
    params = init_params(kp, H, W)
    x = jax.random.normal(kx, (B, S, H * W), jnp.float32)

    out = gated_msr_forward(x, params)
    out = jax.block_until_ready(out)

    ref = jax.block_until_ready(reference_forward(x, params))
    rel_err = float(jnp.max(jnp.abs(out - ref)) / jnp.max(jnp.abs(ref)))
    assert out.shape == (B, S, H * W) and out.dtype == jnp.complex64
    assert rel_err < 5e-2, f"relative error too large: {rel_err}"

    print("KERNEL_OK")
</pallas_src>

<mosaic_0001>
module attributes {stable_mosaic.version = 11 : i64} {
  func.func @kernel(%arg0: i32, %arg1: memref<1x8x32xf32, #tpu.memory_space<vmem>>, %arg2: memref<32x96xbf16, #tpu.memory_space<vmem>>, %arg3: memref<32x32xf32, #tpu.memory_space<vmem>>, %arg4: memref<32x32xbf16, #tpu.memory_space<vmem>>, %arg5: memref<32x32xbf16, #tpu.memory_space<vmem>>, %arg6: memref<1x16x32xf32, #tpu.memory_space<vmem>>, %arg7: memref<16x32xf32, #tpu.memory_space<vmem>>) attributes {dimension_semantics = [#tpu.dimension_semantics<parallel>], iteration_bounds = array<i64: 2>, scalar_prefetch = 0 : i64, scratch_operands = 1 : i64, tpu.core_type = #tpu.core_type<tc>, window_params = [{transform_indices = @transform_0, window_bounds = array<i64: 1, 8, 32>}, {pipeline_mode = #tpu.pipeline_mode<synchronous>, transform_indices = @transform_1, window_bounds = array<i64: 32, 96>}, {pipeline_mode = #tpu.pipeline_mode<synchronous>, transform_indices = @transform_2, window_bounds = array<i64: 32, 32>}, {pipeline_mode = #tpu.pipeline_mode<synchronous>, transform_indices = @transform_3, window_bounds = array<i64: 32, 32>}, {pipeline_mode = #tpu.pipeline_mode<synchronous>, transform_indices = @transform_4, window_bounds = array<i64: 32, 32>}, {transform_indices = @transform_5, window_bounds = array<i64: 1, 16, 32>}]} {
    %c0 = arith.constant 0 : index
    %c0_0 = arith.constant 0 : index
    %c0_1 = arith.constant 0 : index
    %0 = vector.load %arg1[%c0, %c0_0, %c0_1] : memref<1x8x32xf32, #tpu.memory_space<vmem>>, vector<1x8x32xf32>
    %1 = vector.shape_cast %0 : vector<1x8x32xf32> to vector<8x32xf32>
    %2 = arith.truncf %1 : vector<8x32xf32> to vector<8x32xbf16>
    %c0_2 = arith.constant 0 : index
    %c0_3 = arith.constant 0 : index
    %3 = vector.load %arg2[%c0_2, %c0_3] : memref<32x96xbf16, #tpu.memory_space<vmem>>, vector<32x96xbf16>
    %cst = arith.constant dense<0.000000e+00> : vector<8x96xf32>
    %4 = tpu.matmul %2, %3, %cst {dimension_numbers = #tpu.dot_dimension_numbers<[1], [0], [0], [1], [0, 0, 1, 1], [], []>} : vector<8x32xbf16>, vector<32x96xbf16>, vector<8x96xf32> -> vector<8x96xf32>
    %5 = vector.extract_strided_slice %4 {offsets = [0, 0], sizes = [8, 32], strides = [1, 1]} : vector<8x96xf32> to vector<8x32xf32>
    %6 = vector.extract_strided_slice %4 {offsets = [0, 32], sizes = [8, 32], strides = [1, 1]} : vector<8x96xf32> to vector<8x32xf32>
    %7 = vector.extract_strided_slice %4 {offsets = [0, 64], sizes = [8, 32], strides = [1, 1]} : vector<8x96xf32> to vector<8x32xf32>
    %c0_4 = arith.constant 0 : index
    %c0_5 = arith.constant 0 : index
    %8 = vector.load %arg3[%c0_4, %c0_5] : memref<32x32xf32, #tpu.memory_space<vmem>>, vector<8x32xf32>
    %c8 = arith.constant 8 : index
    %c0_6 = arith.constant 0 : index
    %9 = vector.load %arg3[%c8, %c0_6] : memref<32x32xf32, #tpu.memory_space<vmem>>, vector<8x32xf32>
    %c16 = arith.constant 16 : index
    %c0_7 = arith.constant 0 : index
    %10 = vector.load %arg3[%c16, %c0_7] : memref<32x32xf32, #tpu.memory_space<vmem>>, vector<8x32xf32>
    %c24 = arith.constant 24 : index
    %c0_8 = arith.constant 0 : index
    %11 = vector.load %arg3[%c24, %c0_8] : memref<32x32xf32, #tpu.memory_space<vmem>>, vector<8x32xf32>
    %12 = arith.mulf %5, %8 : vector<8x32xf32>
    %13 = arith.mulf %5, %9 : vector<8x32xf32>
    %14 = arith.mulf %6, %10 : vector<8x32xf32>
    %15 = arith.mulf %6, %11 : vector<8x32xf32>
    %16 = tpu.concatenate %12, %13 in 0 : vector<8x32xf32>, vector<8x32xf32> -> vector<16x32xf32>
    %17 = arith.truncf %16 : vector<16x32xf32> to vector<16x32xbf16>
    %cst_9 = arith.constant 0.000000e+00 : f32
    %18 = vector.broadcast %cst_9 : f32 to vector<8x32xf32>
    %19 = arith.subf %18, %12 : vector<8x32xf32>
    %20 = tpu.concatenate %13, %19 in 0 : vector<8x32xf32>, vector<8x32xf32> -> vector<16x32xf32>
    %21 = arith.truncf %20 : vector<16x32xf32> to vector<16x32xbf16>
    %22 = arith.truncf %14 : vector<8x32xf32> to vector<8x32xbf16>
    %23 = arith.truncf %15 : vector<8x32xf32> to vector<8x32xbf16>
    %24 = arith.truncf %7 : vector<8x32xf32> to vector<8x32xbf16>
    %25 = tpu.iota {dimensions = array<i32: 0>} : vector<16x8xi32>
    %26 = tpu.iota {dimensions = array<i32: 1>} : vector<16x8xi32>
    %c8_i32 = arith.constant 8 : i32
    %27 = vector.broadcast %c8_i32 : i32 to vector<16x8xi32>
    %28 = arith.cmpi sge, %25, %27 : vector<16x8xi32>
    %c8_i32_10 = arith.constant 8 : i32
    %29 = vector.broadcast %c8_i32_10 : i32 to vector<16x8xi32>
    %30 = arith.subi %25, %29 : vector<16x8xi32>
    %31 = arith.select %28, %30, %25 : vector<16x8xi1>, vector<16x8xi32>
    %32 = arith.cmpi sge, %31, %26 : vector<16x8xi32>
    %33 = vector.extract_strided_slice %17 {offsets = [0, 0], sizes = [16, 16], strides = [1, 1]} : vector<16x32xbf16> to vector<16x16xbf16>
    %34 = vector.extract_strided_slice %21 {offsets = [0, 0], sizes = [16, 16], strides = [1, 1]} : vector<16x32xbf16> to vector<16x16xbf16>
    %35 = tpu.concatenate %33, %34 in 1 : vector<16x16xbf16>, vector<16x16xbf16> -> vector<16x32xbf16>
    %36 = vector.extract_strided_slice %22 {offsets = [0, 0], sizes = [8, 16], strides = [1, 1]} : vector<8x32xbf16> to vector<8x16xbf16>
    %37 = vector.extract_strided_slice %23 {offsets = [0, 0], sizes = [8, 16], strides = [1, 1]} : vector<8x32xbf16> to vector<8x16xbf16>
    %38 = tpu.concatenate %36, %37 in 1 : vector<8x16xbf16>, vector<8x16xbf16> -> vector<8x32xbf16>
    %cst_11 = arith.constant dense<0.000000e+00> : vector<16x8xf32>
    %39 = tpu.matmul %35, %38, %cst_11 {dimension_numbers = #tpu.dot_dimension_numbers<[1], [1], [0], [0], [0, 0, 1, 0], [], []>} : vector<16x32xbf16>, vector<8x32xbf16>, vector<16x8xf32> -> vector<16x8xf32>
    %cst_12 = arith.constant 0.000000e+00 : f32
    %40 = vector.broadcast %cst_12 : f32 to vector<16x8xf32>
    %41 = arith.select %32, %39, %40 : vector<16x8xi1>, vector<16x8xf32>
    %42 = arith.truncf %41 : vector<16x8xf32> to vector<16x8xbf16>
    %43 = vector.extract_strided_slice %24 {offsets = [0, 0], sizes = [8, 16], strides = [1, 1]} : vector<8x32xbf16> to vector<8x16xbf16>
    %cst_13 = arith.constant dense<0.000000e+00> : vector<16x16xf32>
    %44 = tpu.matmul %42, %43, %cst_13 {dimension_numbers = #tpu.dot_dimension_numbers<[1], [0], [0], [1], [0, 0, 1, 1], [], []>} : vector<16x8xbf16>, vector<8x16xbf16>, vector<16x16xf32> -> vector<16x16xf32>
    %45 = arith.mulf %44, %44 : vector<16x16xf32>
    %cst_14 = arith.constant dense<0.000000e+00> : vector<16xf32>
    %46 = vector.multi_reduction <add>, %45, %cst_14 [1] : vector<16x16xf32> to vector<16xf32>
    %47 = vector.shape_cast %46 : vector<16xf32> to vector<16x1xf32>
    %48 = vector.extract_strided_slice %47 {offsets = [0, 0], sizes = [8, 1], strides = [1, 1]} : vector<16x1xf32> to vector<8x1xf32>
    %49 = vector.extract_strided_slice %47 {offsets = [8, 0], sizes = [8, 1], strides = [1, 1]} : vector<16x1xf32> to vector<8x1xf32>
    %50 = arith.addf %48, %49 : vector<8x1xf32>
    %51 = math.rsqrt %50 : vector<8x1xf32>
    %52 = tpu.concatenate %51, %51 in 0 : vector<8x1xf32>, vector<8x1xf32> -> vector<16x1xf32>
    %53 = vector.broadcast %52 : vector<16x1xf32> to vector<16x16xf32>
    %54 = arith.mulf %44, %53 : vector<16x16xf32>
    %c0_15 = arith.constant 0 : index
    %c0_16 = arith.constant 0 : index
    %55 = vector.load %arg7[%c0_15, %c0_16] : memref<16x32xf32, #tpu.memory_space<vmem>>, vector<16x16xf32>
    tpu.vector_store %arg7[%c0_15, %c0_16], %54 {strides = array<i32>} : memref<16x32xf32, #tpu.memory_space<vmem>>, vector<16x16xf32>,
    %56 = vector.extract_strided_slice %17 {offsets = [0, 16], sizes = [16, 16], strides = [1, 1]} : vector<16x32xbf16> to vector<16x16xbf16>
    %57 = vector.extract_strided_slice %21 {offsets = [0, 16], sizes = [16, 16], strides = [1, 1]} : vector<16x32xbf16> to vector<16x16xbf16>
    %58 = tpu.concatenate %56, %57 in 1 : vector<16x16xbf16>, vector<16x16xbf16> -> vector<16x32xbf16>
    %59 = vector.extract_strided_slice %22 {offsets = [0, 16], sizes = [8, 16], strides = [1, 1]} : vector<8x32xbf16> to vector<8x16xbf16>
    %60 = vector.extract_strided_slice %23 {offsets = [0, 16], sizes = [8, 16], strides = [1, 1]} : vector<8x32xbf16> to vector<8x16xbf16>
    %61 = tpu.concatenate %59, %60 in 1 : vector<8x16xbf16>, vector<8x16xbf16> -> vector<8x32xbf16>
    %cst_17 = arith.constant dense<0.000000e+00> : vector<16x8xf32>
    %62 = tpu.matmul %58, %61, %cst_17 {dimension_numbers = #tpu.dot_dimension_numbers<[1], [1], [0], [0], [0, 0, 1, 0], [], []>} : vector<16x32xbf16>, vector<8x32xbf16>, vector<16x8xf32> -> vector<16x8xf32>
    %cst_18 = arith.constant 0.000000e+00 : f32
    %63 = vector.broadcast %cst_18 : f32 to vector<16x8xf32>
    %64 = arith.select %32, %62, %63 : vector<16x8xi1>, vector<16x8xf32>
    %65 = arith.truncf %64 : vector<16x8xf32> to vector<16x8xbf16>
    %66 = vector.extract_strided_slice %24 {offsets = [0, 16], sizes = [8, 16], strides = [1, 1]} : vector<8x32xbf16> to vector<8x16xbf16>
    %cst_19 = arith.constant dense<0.000000e+00> : vector<16x16xf32>
    %67 = tpu.matmul %65, %66, %cst_19 {dimension_numbers = #tpu.dot_dimension_numbers<[1], [0], [0], [1], [0, 0, 1, 1], [], []>} : vector<16x8xbf16>, vector<8x16xbf16>, vector<16x16xf32> -> vector<16x16xf32>
    %68 = arith.mulf %67, %67 : vector<16x16xf32>
    %cst_20 = arith.constant dense<0.000000e+00> : vector<16xf32>
    %69 = vector.multi_reduction <add>, %68, %cst_20 [1] : vector<16x16xf32> to vector<16xf32>
    %70 = vector.shape_cast %69 : vector<16xf32> to vector<16x1xf32>
    %71 = vector.extract_strided_slice %70 {offsets = [0, 0], sizes = [8, 1], strides = [1, 1]} : vector<16x1xf32> to vector<8x1xf32>
    %72 = vector.extract_strided_slice %70 {offsets = [8, 0], sizes = [8, 1], strides = [1, 1]} : vector<16x1xf32> to vector<8x1xf32>
    %73 = arith.addf %71, %72 : vector<8x1xf32>
    %74 = math.rsqrt %73 : vector<8x1xf32>
    %75 = tpu.concatenate %74, %74 in 0 : vector<8x1xf32>, vector<8x1xf32> -> vector<16x1xf32>
    %76 = vector.broadcast %75 : vector<16x1xf32> to vector<16x16xf32>
    %77 = arith.mulf %67, %76 : vector<16x16xf32>
    %c0_21 = arith.constant 0 : index
    %c16_22 = arith.constant 16 : index
    %78 = vector.load %arg7[%c0_21, %c16_22] : memref<16x32xf32, #tpu.memory_space<vmem>>, vector<16x16xf32>
    tpu.vector_store %arg7[%c0_21, %c16_22], %77 {strides = array<i32>} : memref<16x32xf32, #tpu.memory_space<vmem>>, vector<16x16xf32>,
    %c0_23 = arith.constant 0 : index
    %c0_24 = arith.constant 0 : index
    %79 = vector.load %arg7[%c0_23, %c0_24] : memref<16x32xf32, #tpu.memory_space<vmem>>, vector<16x32xf32>
    %80 = arith.truncf %79 : vector<16x32xf32> to vector<16x32xbf16>
    %c0_25 = arith.constant 0 : index
    %c0_26 = arith.constant 0 : index
    %81 = vector.load %arg4[%c0_25, %c0_26] : memref<32x32xbf16, #tpu.memory_space<vmem>>, vector<32x32xbf16>
    %cst_27 = arith.constant dense<0.000000e+00> : vector<16x32xf32>
    %82 = tpu.matmul %80, %81, %cst_27 {dimension_numbers = #tpu.dot_dimension_numbers<[1], [0], [0], [1], [0, 0, 1, 1], [], []>} : vector<16x32xbf16>, vector<32x32xbf16>, vector<16x32xf32> -> vector<16x32xf32>
    %83 = vector.extract_strided_slice %82 {offsets = [0, 0], sizes = [8, 32], strides = [1, 1]} : vector<16x32xf32> to vector<8x32xf32>
    %84 = vector.extract_strided_slice %82 {offsets = [8, 0], sizes = [8, 32], strides = [1, 1]} : vector<16x32xf32> to vector<8x32xf32>
    %cst_28 = arith.constant -2.000000e+00 : f32
    %85 = vector.broadcast %cst_28 : f32 to vector<8x32xf32>
    %86 = arith.mulf %85, %83 : vector<8x32xf32>
    %87 = math.exp %86 : vector<8x32xf32>
    %cst_29 = arith.constant 2.000000e+00 : f32
    %88 = vector.broadcast %cst_29 : f32 to vector<8x32xf32>
    %89 = arith.mulf %88, %84 : vector<8x32xf32>
    %90 = math.cos %89 : vector<8x32xf32>
    %91 = arith.mulf %87, %90 : vector<8x32xf32>
    %cst_30 = arith.constant 1.000000e+00 : f32
    %92 = vector.broadcast %cst_30 : f32 to vector<8x32xf32>
    %93 = arith.addf %92, %91 : vector<8x32xf32>
    %cst_31 = arith.constant 0.000000e+00 : f32
    %94 = vector.broadcast %cst_31 : f32 to vector<8x32xf32>
    %95 = arith.subf %94, %87 : vector<8x32xf32>
    %cst_32 = arith.constant 2.000000e+00 : f32
    %96 = vector.broadcast %cst_32 : f32 to vector<8x32xf32>
    %97 = arith.mulf %96, %84 : vector<8x32xf32>
    %98 = math.sin %97 : vector<8x32xf32>
    %99 = arith.mulf %95, %98 : vector<8x32xf32>
    %100 = arith.mulf %93, %93 : vector<8x32xf32>
    %101 = arith.mulf %99, %99 : vector<8x32xf32>
    %102 = arith.addf %100, %101 : vector<8x32xf32>
    %103 = tpu.reciprocal %102 {approx = true} : vector<8x32xf32> -> vector<8x32xf32>
    %104 = arith.mulf %83, %93 : vector<8x32xf32>
    %105 = arith.mulf %84, %99 : vector<8x32xf32>
    %106 = arith.addf %104, %105 : vector<8x32xf32>
    %107 = arith.mulf %106, %103 : vector<8x32xf32>
    %108 = arith.mulf %84, %93 : vector<8x32xf32>
    %109 = arith.mulf %83, %99 : vector<8x32xf32>
    %110 = arith.subf %108, %109 : vector<8x32xf32>
    %111 = arith.mulf %110, %103 : vector<8x32xf32>
    %112 = vector.extract_strided_slice %79 {offsets = [0, 0], sizes = [8, 32], strides = [1, 1]} : vector<16x32xf32> to vector<8x32xf32>
    %113 = vector.extract_strided_slice %79 {offsets = [8, 0], sizes = [8, 32], strides = [1, 1]} : vector<16x32xf32> to vector<8x32xf32>
    %114 = arith.mulf %112, %107 : vector<8x32xf32>
    %115 = arith.mulf %113, %111 : vector<8x32xf32>
    %116 = arith.subf %114, %115 : vector<8x32xf32>
    %117 = arith.mulf %112, %111 : vector<8x32xf32>
    %118 = arith.mulf %113, %107 : vector<8x32xf32>
    %119 = arith.addf %117, %118 : vector<8x32xf32>
    %120 = tpu.concatenate %116, %119 in 0 : vector<8x32xf32>, vector<8x32xf32> -> vector<16x32xf32>
    %121 = arith.truncf %120 : vector<16x32xf32> to vector<16x32xbf16>
    %c0_33 = arith.constant 0 : index
    %c0_34 = arith.constant 0 : index
    %122 = vector.load %arg5[%c0_33, %c0_34] : memref<32x32xbf16, #tpu.memory_space<vmem>>, vector<32x32xbf16>
    %cst_35 = arith.constant dense<0.000000e+00> : vector<16x32xf32>
    %123 = tpu.matmul %121, %122, %cst_35 {dimension_numbers = #tpu.dot_dimension_numbers<[1], [0], [0], [1], [0, 0, 1, 1], [], []>} : vector<16x32xbf16>, vector<32x32xbf16>, vector<16x32xf32> -> vector<16x32xf32>
    %c0_36 = arith.constant 0 : index
    %c0_37 = arith.constant 0 : index
    %c0_38 = arith.constant 0 : index
    %124 = vector.load %arg6[%c0_36, %c0_37, %c0_38] : memref<1x16x32xf32, #tpu.memory_space<vmem>>, vector<1x16x32xf32>
    %125 = vector.shape_cast %124 : vector<1x16x32xf32> to vector<16x32xf32>
    %126 = vector.shape_cast %123 : vector<16x32xf32> to vector<1x16x32xf32>
    tpu.vector_store %arg6[%c0_36, %c0_37, %c0_38], %126 {strides = array<i32>} : memref<1x16x32xf32, #tpu.memory_space<vmem>>, vector<1x16x32xf32>,
    return
  }
  func.func @transform_0(%arg0: i32) -> (i32, i32, i32) {
    %c0_i32 = arith.constant 0 : i32
    %c0_i32_0 = arith.constant 0 : i32
    %c0_i32_1 = arith.constant 0 : i32
    return %arg0, %c0_i32, %c0_i32_0 : i32, i32, i32
  }
  func.func @transform_1(%arg0: i32) -> (i32, i32) {
    %c0_i32 = arith.constant 0 : i32
    %c0_i32_0 = arith.constant 0 : i32
    %c0_i32_1 = arith.constant 0 : i32
    return %c0_i32, %c0_i32_0 : i32, i32
  }
  func.func @transform_2(%arg0: i32) -> (i32, i32) {
    %c0_i32 = arith.constant 0 : i32
    %c0_i32_0 = arith.constant 0 : i32
    %c0_i32_1 = arith.constant 0 : i32
    return %c0_i32, %c0_i32_0 : i32, i32
  }
  func.func @transform_3(%arg0: i32) -> (i32, i32) {
    %c0_i32 = arith.constant 0 : i32
    %c0_i32_0 = arith.constant 0 : i32
    %c0_i32_1 = arith.constant 0 : i32
    return %c0_i32, %c0_i32_0 : i32, i32
  }
  func.func @transform_4(%arg0: i32) -> (i32, i32) {
    %c0_i32 = arith.constant 0 : i32
    %c0_i32_0 = arith.constant 0 : i32
    %c0_i32_1 = arith.constant 0 : i32
    return %c0_i32, %c0_i32_0 : i32, i32
  }
  func.func @transform_5(%arg0: i32) -> (i32, i32, i32) {
    %c0_i32 = arith.constant 0 : i32
    %c0_i32_0 = arith.constant 0 : i32
    %c0_i32_1 = arith.constant 0 : i32
    return %arg0, %c0_i32, %c0_i32_0 : i32, i32, i32
  }
}

</mosaic_0001>

<bundles_post_ra>
// kernel: tpu_custom_call.1
= control target key start
LH: loop header
LB: loop body
LE: loop exit
PB: predicated region body
PF: predicated region fallthrough
CT: control target
= control target key end

     0   :  { %10 = vsyncpa [#allocation4], 0  ;;  %s2055_s0 = inlined_call_operand.hbm [shape: f32[2,8,32], index: 0, kind: input, shape index: {}]   ;;  %s2056_s1 = inlined_call_operand.hbm [shape: bf16[32,96], index: 1, kind: input, shape index: {}]   ;;  %s2057_s2 = inlined_call_operand.hbm [shape: f32[32,32], index: 2, kind: input, shape index: {}]   ;;  %s2058_s3 = inlined_call_operand.hbm [shape: bf16[32,32], index: 3, kind: input, shape index: {}]   ;;  %s2059_s4 = inlined_call_operand.hbm [shape: bf16[32,32], index: 4, kind: input, shape index: {}]   ;;  %s2060_s5 = inlined_call_operand.hbm [shape: f32[2,16,32], index: 5, kind: output, shape index: {}]  }
   0x1   :  { %12 = vsyncpa [#allocation4 + $0x1], 0 }
   0x2   :  { %13 = vsyncpa [#allocation7], 0 }
   0x3   :  { %14 = vsyncpa [#allocation10], 0 }
   0x4   :  { %15 = vsyncpa [#allocation5], 0 }
   0x5   :  { %17 = vsyncpa [#allocation5 + $0x1], 0  ;;  %s1670_s18 = smov 0   ;;  %s1672_s19 = smov 0  }
   0x6   :  { %s1674_s20 = smov 0   ;;  %s1676_s21 = smov 0  }
   0x7 LB: > { %s1612_s22 = smov [#allocation6]   ;;  %s1691_s24 = sadd.s32 4294967295, %s1610_s21   ;;  %s1610_s21 = sphi %s1676_s21, %s2084_s21   ;;  %s1606_s20 = sphi %s1674_s20, %s2083_s20   ;;  %s1602_s19 = sphi %s1672_s19, %s2082_s19   ;;  %s1598_s18 = sphi %s1670_s18, %s2081_s18  }
   0x8   : > { %s176_s23 = sshll.u32 %s1612_s22, 4  ;;  %p1153_p0 = scmp.ge.s32.totalorder %s1610_s21, 1  ;;  %s1696_s23 = int_to_ptr.vmem [resolvable:$true] %s176_s23 }
   0x9   : > { %p2061_p1 = scmp.eq.s32.totalorder %s1691_s24, 0  ;;  %p164_p2 = scmp.lt.s32.totalorder %s1610_s21, 3 }
   0xa   : > { %s1613_s26 = smov [#allocation9]   ;;  %s1614_s29 = smov [#allocation8]  }
   0xb   : > { %p1698_p3 = pnand %p1153_p0, %p164_p2  ;;  %s202_s27 = sshll.u32 %s1613_s26, 4  ;;  %s1711_s27 = int_to_ptr.vmem [resolvable:$true] %s202_s27 }
   0xc   : > { %s189_s30 = sshll.u32 %s1614_s29, 4  ;;  %s1394_s8 = scalar_lea.hbm %s2056_s1, 256  ;;  %s1713_s30 = int_to_ptr.vmem [resolvable:$true] %s189_s30 }
   0xd   : > { %s2064_s25 = scalar_select %p1698_p3, 1, 0 }
   0xe   : > { %p1285_p5 = pneg %p1698_p3  ;;  %p1395_p7 = scmp.ne.s32.totalorder %s2056_s1, %s1394_s8 }
   0xf   : > { %p1401_p11 = scmp.lt.u32.totalorder %s1394_s8, %s2056_s1 }
  0x10   : > { %p1707_p6 = pnand %p1285_p5, %p2061_p1 }
  0x12   : > { %p1723_p8 = pneg %p1707_p6 }
  0x14   : > { %p1397_p9 = pnand %p1723_p8, %p1395_p7 }
  0x16   : > { %p1398_p10 = pneg %p1397_p9 }
  0x18   : > { %p1403_p12 = pnand %p1401_p11, %p1398_p10 }
  0x1a   : > { %1406 = shalt.err (!%p1403_p12)
}
  0x1b   : > { %s1407_s14 = scalar_lea.vmem %s1696_s23, 256  ;;  %p1415_p5 = scmp.lt.s32.totalorder %s1696_s23, %s1696_s23 }
  0x1c   : > { %p1408_p13 = scmp.ne.s32.totalorder %s1696_s23, %s1407_s14  ;;  %p1416_p4 = scmp.lt.s32.totalorder %s1407_s14, %s1407_s14 }
  0x1e   : > { %p1410_p0 = pnand %p1408_p13, %p1723_p8  ;;  %p1417_p7 = por %p1416_p4, %p1415_p5 }
  0x20   : > { %p1411_p2 = pneg %p1410_p0 }
  0x22   : > { %p1418_p9 = pnand %p1417_p7, %p1411_p2 }
  0x24   : > { %1421 = shalt.err (!%p1418_p9)
}
  0x25   : > { %s1615_s15 = smov 64   ;;  %s1616_s16 = smov 4  }
  0x26   : > { %1288 = dma.hbm_to_vmem [thread:$0]  (!%p1707_p6), %s2056_s1, 256, %s1696_s23, [#allocation7], %s1615_s15, %s1615_s15, %s1616_s16  }
  0x27   : > { %s1422_s6 = scalar_lea.hbm %s2058_s3, 256 }
  0x28   : > { %p1423_p4 = scmp.ne.s32.totalorder %s2058_s3, %s1422_s6  ;;  %p1429_p12 = scmp.lt.u32.totalorder %s1422_s6, %s2058_s3 }
  0x2a   : > { %p1425_p10 = pnand %p1423_p4, %p1723_p8 }
  0x2c   : > { %p1426_p11 = pneg %p1425_p10 }
  0x2e   : > { %p1431_p13 = pnand %p1429_p12, %p1426_p11 }
  0x30   : > { %1434 = shalt.err (!%p1431_p13)
}
  0x31   : > { %s1435_s23 = scalar_lea.vmem %s1711_s27, 256  ;;  %p1443_p7 = scmp.lt.s32.totalorder %s1711_s27, %s1711_s27 }
  0x32   : > { %p1436_p0 = scmp.ne.s32.totalorder %s1711_s27, %s1435_s23  ;;  %p1444_p9 = scmp.lt.s32.totalorder %s1435_s23, %s1435_s23 }
  0x34   : > { %p1438_p2 = pnand %p1436_p0, %p1723_p8  ;;  %p1445_p4 = por %p1444_p9, %p1443_p7 }
  0x36   : > { %p1439_p5 = pneg %p1438_p2 }
  0x38   : > { %p1446_p10 = pnand %p1445_p4, %p1439_p5 }
  0x3a   : > { %1449 = shalt.err (!%p1446_p10)
}
  0x3b   : > { %1294 = dma.hbm_to_vmem [thread:$0]  (!%p1707_p6), %s2058_s3, 256, %s1711_s27, [#allocation10], %s1615_s15, %s1615_s15, %s1616_s16  }
  0x3c   : > { %s1450_s22 = scalar_lea.hbm %s2057_s2, 512 }
  0x3d   : > { %p1451_p11 = scmp.ne.s32.totalorder %s2057_s2, %s1450_s22  ;;  %p1457_p0 = scmp.lt.u32.totalorder %s1450_s22, %s2057_s2 }
  0x3f   : > { %p1453_p12 = pnand %p1451_p11, %p1723_p8 }
  0x41   : > { %p1454_p13 = pneg %p1453_p12 }
  0x43   : > { %p1459_p2 = pnand %p1457_p0, %p1454_p13 }
  0x45   : > { %1462 = shalt.err (!%p1459_p2)
}
  0x46   : > { %s1463_s27 = scalar_lea.vmem %s1713_s30, 512  ;;  %p1471_p4 = scmp.lt.s32.totalorder %s1713_s30, %s1713_s30 }
  0x47   : > { %p1464_p5 = scmp.ne.s32.totalorder %s1713_s30, %s1463_s27  ;;  %p1472_p10 = scmp.lt.s32.totalorder %s1463_s27, %s1463_s27 }
  0x49   : > { %p1466_p7 = pnand %p1464_p5, %p1723_p8  ;;  %p1473_p11 = por %p1472_p10, %p1471_p4 }
  0x4b   : > { %p1467_p9 = pneg %p1466_p7 }
  0x4d   : > { %p1474_p12 = pnand %p1473_p11, %p1467_p9 }
  0x4f   : > { %1477 = shalt.err (!%p1474_p12)
}
  0x50   : > { %s1617_s8 = smov 128   ;;  %s1618_s9 = smov 8  }
  0x51   : > { %1291 = dma.hbm_to_vmem [thread:$0]  (!%p1707_p6), %s2057_s2, 512, %s1713_s30, [#allocation7], %s1617_s8, %s1617_s8, %s1618_s9  }
  0x52   : > { %s1619_s12 = smov [#allocation11]   ;;  %s1478_s22 = scalar_lea.hbm %s2059_s4, 256 }
  0x53   : > { %s215_s13 = sshll.u32 %s1619_s12, 4  ;;  %p1479_p13 = scmp.ne.s32.totalorder %s2059_s4, %s1478_s22  ;;  %s216_s13 = int_to_ptr.vmem [resolvable:$true] %s215_s13 }
  0x54   : > { %p1485_p5 = scmp.lt.u32.totalorder %s1478_s22, %s2059_s4 }
  0x55   : > { %p1481_p0 = pnand %p1479_p13, %p1723_p8 }
  0x57   : > { %p1482_p2 = pneg %p1481_p0 }
  0x59   : > { %p1487_p7 = pnand %p1485_p5, %p1482_p2 }
  0x5b   : > { %1490 = shalt.err (!%p1487_p7)
}
  0x5c   : > { %s1491_s30 = scalar_lea.vmem %s216_s13, 256  ;;  %p1499_p11 = scmp.lt.s32.totalorder %s216_s13, %s216_s13 }
  0x5d   : > { %p1492_p9 = scmp.ne.s32.totalorder %s216_s13, %s1491_s30  ;;  %p1500_p12 = scmp.lt.s32.totalorder %s1491_s30, %s1491_s30 }
  0x5f   : > { %p1494_p4 = pnand %p1492_p9, %p1723_p8  ;;  %p1501_p1 = por %p1500_p12, %p1499_p11 }
  0x61   : > { %p1495_p10 = pneg %p1494_p4 }
  0x63   : > { %p1502_p3 = pnand %p1501_p1, %p1495_p10 }
  0x65   : > { %1505 = shalt.err (!%p1502_p3)
}
  0x66   : > { %1297 = dma.hbm_to_vmem [thread:$0]  (!%p1707_p6), %s2059_s4, 256, %s216_s13, [#allocation10], %s1615_s15, %s1615_s15, %s1616_s16  }
  0x67   : > { %s1152_s28 = sadd.s32 4294967294, %s1610_s21   ;;  %s1819_s11 = sadd.s32 1, %s1610_s21  }
  0x68   : > { %s27_s9 = ssub.s32 %s1610_s21, %s1819_s11  ;;  %s30_s10 = sadd.s32 1, %s1606_s20 }
  0x69   : > { %p28_p1 = scmp.eq.s32.totalorder %s27_s9, 0  ;;  %p37_p3 = scmp.ne.s32.totalorder %s1606_s20, %s1602_s19 }
  0x6a   : > { %p38_p8 = scmp.eq.s32.totalorder %s1610_s21, 0  ;;  %p43_p13 = scmp.ne.s32.totalorder %s1602_s19, %s1598_s18 }
  0x6b   : > { %s1830_s23 = scalar_select %p28_p1, %s1606_s20, %s30_s10  }
  0x6c   : > { %p1832_p0 = por %p38_p8, %p37_p3  ;;  %p2068_p2 = scmp.eq.s32.totalorder %s1691_s24, 0 }
  0x6d   : > { %p151_p5 = scmp.eq.s32.totalorder %s1691_s24, 1  ;;  %p157_p7 = scmp.eq.s32.totalorder %s1152_s28, 1 }
  0x6e   : > { %p1838_p6 = por %p2068_p2, %p43_p13  ;;  %p1310_p9 = scmp.lt.s32.totalorder %s1610_s21, 2 }
  0x6f   : > { %s229_s16 = sand.u32 1, %s1606_s20   ;;  %p1845_p4 = por %p151_p5, %p37_p3 }
  0x70   : > { %p1849_p10 = por %p157_p7, %p43_p13  ;;  %s1159_s17 = sshll.u32 %s229_s16, 3 }
  0x71   : > { %s2070_s13 = scalar_select %p1845_p4, 1, 0 }
  0x72   : > { %s2071_s14 = scalar_select %p1849_p10, 1, 0 }
  0x73   : > { %s1160_s22 = sshll.u32 %s1610_s21, 7  ;;  %s233_s7 = scalar_lea.vmem [#allocation3], %s1159_s17 }
  0x74   : > { %s1857_s6 = scalar_lea.hbm %s2055_s0, %s1160_s22  ;;  %s240_s30 = sshll.u32 %s233_s7, 4  ;;  %s1859_s30 = int_to_ptr.vmem [resolvable:$true] %s240_s30 }
  0x75   : > { %p1863_p11 = pnand %p1310_p9, %p1832_p0  ;;  %s230_s8 = scalar_lea.sflag [#allocation4], %s229_s16 }
  0x76   : > { %s1506_s28 = scalar_lea.hbm %s1857_s6, 128  ;;  %s1511_s17 = scalar_lea.hbm %s2055_s0, 256 }
  0x77   : > { %p1507_p12 = scmp.ne.s32.totalorder %s1857_s6, %s1506_s28  ;;  %p1508_p1 = pneg %p1863_p11 }
  0x78   : > { %p1512_p13 = scmp.lt.u32.totalorder %s1857_s6, %s2055_s0  ;;  %p1513_p0 = scmp.lt.u32.totalorder %s1511_s17, %s1506_s28 }
  0x79   : > { %p1509_p3 = pnand %p1508_p1, %p1507_p12  ;;  %p1515_p5 = scmp.lt.u32.totalorder %s1506_s28, %s1857_s6 }
  0x7a   : > { %p1514_p2 = por %p1513_p0, %p1512_p13 }
  0x7b   : > { %p1510_p8 = pneg %p1509_p3 }
  0x7c   : > { %p1516_p7 = por %p1515_p5, %p1514_p2 }
  0x7e   : > { %p1517_p9 = pnand %p1516_p7, %p1510_p8 }
  0x80   : > { %1520 = shalt.err (!%p1517_p9)
}
  0x81   : > { %s1521_s16 = scalar_lea.vmem %s1859_s30, 128  ;;  %s1620_s26 = smov [#allocation3]  }
  0x82   : > { %p1522_p12 = scmp.ne.s32.totalorder %s1859_s30, %s1521_s16  ;;  %s1526_s29 = sshll.u32 %s1620_s26, 4  ;;  %s1527_s29 = int_to_ptr.vmem [resolvable:$false] %s1526_s29 }
  0x83   : > { %s1528_s7 = scalar_lea.vmem %s1527_s29, 256  ;;  %p1529_p4 = scmp.lt.s32.totalorder %s1859_s30, %s1527_s29 }
  0x84   : > { %p1524_p3 = pnand %p1522_p12, %p1508_p1  ;;  %p1530_p13 = scmp.lt.s32.totalorder %s1528_s7, %s1521_s16 }
  0x86   : > { %p1525_p10 = pneg %p1524_p3  ;;  %p1531_p0 = por %p1530_p13, %p1529_p4 }
  0x88   : > { %p1532_p2 = pnand %p1531_p0, %p1525_p10 }
  0x8a   : > { %1535 = shalt.err (!%p1532_p2)
}
  0x8b   : > { %1301 = dma.hbm_to_vmem [thread:$0]  (!%p1863_p11), %s1857_s6, 128, %s1859_s30, %s230_s8  }
  0x8c   : > { %p2073_p8 = scmp.ne.s32.totalorder %s2064_s25, 0 }
  0x8d   : > { %s1895_s28 = sand.u32 (!%p2073_p8), 1, %s1602_s19  }
  0x8e   : > { %249 = sbr.rel (%p2073_p8) target bundleno = 1917 (0x77d), region = 40  ;;  %s1162_s9 = sshll.u32 (!%p2073_p8), %s1895_s28, 3 }
  0x8f   : > { %s252_s10 = scalar_lea.sflag (!%p2073_p8), [#allocation4], %s1895_s28  ;;  %s255_s17 = scalar_lea.vmem (!%p2073_p8), [#allocation3], %s1162_s9 }
  0x95   : > { %1581 = dma.done.wait (%p1838_p6), %s252_s10, 128  }
  0x96   : > { %1583 = vsyncadd (%p1838_p6), %s252_s10, 4294967168  ;;  %p2074_p4 = scmp.eq.s32.totalorder %s1691_s24, 0 }
  0x98   : > { %1585 = dma.done.wait (%p2074_p4), [#allocation7], 768   ;;  %p2075_p10 = pmov %p2074_p4 }
  0x99   : > { %p2076_p11 = pmov %p2074_p4 }
  0x9a   : > { %1587 = vsyncadd (%p2075_p10), [#allocation7], 4294966528 }
  0x9b   : > { %1589 = dma.done.wait (%p2076_p11), [#allocation10], 512   ;;  %p2077_p1 = pmov %p2074_p4 }
  0x9c   : > { %v1621_v0 = vmov 0.0   ;;  %vm1622_vm0 = vmmov 0   ;;  %v1376_v1 = vld [vmem:[#allocation6] sm:$0xff]   ;;  %v1377_v2 = vld [vmem:[#allocation6 + $0x8] sm:$0xff]   ;;  %v299_v3 = vld [vmem:[%s255_s17] sm:$0xff]  ;;  %s1623_s25 = smov 32   ;;  %v383_v39 = vlaneseq }
  0x9d   : > { %1591 = vsyncadd (%p2077_p1), [#allocation10], 4294966784  ;;  %1213 = vmatprep.subr.bf16.mxu0 %v1621_v0  ;;  %1217 = vmatprep.mubr.msk.bf16.mxu0 %vm1622_vm0, %v1621_v0  ;;  %v363_v4 = vld [vmem:[#allocation8 + $0x10] sm:$0xff]  ;;  %v364_v5 = vld [vmem:[#allocation8 + $0x18] sm:$0xff]  ;;  %v300_v6 = vpack.c.bf16 %v299_v3, %v299_v3  ;;  %vm317_vm1 = vcmask 261120   ;;  %s1624_s15 = smov 96  }
  0x9e   : > { %1221 = vmatprep.subr.bf16.mxu1 %v1621_v0  ;;  %1223 = vmatprep.mubr.msk.bf16.mxu1 %vm1622_vm0, %v1621_v0  ;;  %v361_v8 = vld [vmem:[#allocation8] sm:$0xff]  ;;  %v362_v11 = vld [vmem:[#allocation8 + $0x8] sm:$0xff]  ;;  %s1625_s6 = smov 16   ;;  %s1626_s30 = smov 112   ;;  %vm398_vm2 = vcmask 130048   ;;  %vm466_vm3 = vcmask 1043456  }
  0x9f   : > { %1214 = vmatpush3.bf16.msra.mxu0 %v1376_v1  ;;  %368 = vrot.lane.b32.xlu0 %v363_v4, %s1623_s25  ;;  %s1627_s27 = smov 80   ;;  %s1628_s8 = smov 64   ;;  %v384_v40 = vshrl.u32 %v383_v39, 7  ;;  %v387_v41 = vand.u32 127, %v383_v39  ;;  %vm462_vm5 = vcmask 64512   ;;  %vm665_vm6 = vcmask 261248  }
  0xa0   : > { %1215 = vmatprep.subr.bf16.mxu0 %v1621_v0  ;;  %s1629_s12 = smov 48   ;;  %s1167_s22 = sshll.u32 %s1895_s28, 4 }
  0xa1   : > { %vm393_vm4 = vcmp.ge.s32.totalorder %v384_v40, %v387_v41  ;;  %s297_s16 = scalar_lea.vmem [#allocation12], %s1167_s22  ;;  %s1195_s29 = sshll.u32 %s1691_s24, 8 }
  0xa2   : > { %s1041_s26 = sshll.u32 %s297_s16, 4  ;;  %s2009_s10 = scalar_lea.hbm %s2060_s5, %s1195_s29  ;;  %s2004_s26 = int_to_ptr.vmem [resolvable:$true] %s1041_s26 }
  0xa3   : > { %1216 = vmatpush3.bf16.msra.mxu0 %v1377_v2  ;;  %373 = vrot.lane.b32.xlu0 %v364_v5, %s1623_s25  ;;  %s1028_s17 = scalar_lea.sflag [#allocation5], %s1895_s28  ;;  %s1536_s24 = scalar_lea.vmem %s2004_s26, 256 }
  0xa4   : > { %1227 = vmatprep.subr.bf16.mxu0 %v1621_v0  ;;  %p1537_p6 = scmp.ne.s32.totalorder %s2004_s26, %s1536_s24  ;;  %p2078_p5 = scmp.ne.s32.totalorder %s2070_s13, 0 }
  0xa5   : > { %s1637_s25 = smov [#allocation12]  }
  0xa6   : > { %1218 = vmatmul.mubr.msk.bf16.vlgmr.msra.gmra.mrb[0].mxu0 %vm317_vm1, %v300_v6  ;;  %p1538_p7 = pnand %p1537_p6, %p2078_p5 }
  0xa7   : > { %1229 = vmatprep.mubr.msk.bf16.mxu0 %vm1622_vm0, %v1621_v0 }
  0xa8   : > { %p1539_p9 = pneg %p1538_p7 }
 0x111   : > { %v369_v7 = vpop.permute.xlu0 %368 }
 0x115   : > { %v374_v9 = vpop.permute.xlu0 %373 }
 0x179   : > { %v355_v10 = vpop.f32.mrb[0].mxu0 }
 0x17a   : > { %v1219_v12 = vpop.f32.mrb[1].mxu0  ;;  %v371_v13 = vmul.f32 %v369_v7, %v355_v10  ;;  %v365_v14 = vmul.f32 %v361_v8, %v355_v10  ;;  %v366_v18 = vmul.f32 %v362_v11, %v355_v10  ;;  %v376_v20 = vmul.f32 %v374_v9, %v355_v10 }
 0x17b   : > { %v358_v15 = vpop.f32.mrb[2].mxu0  ;;  %v382_v23 = vpack.c.bf16 %v355_v10, %v355_v10  ;;  %v1630_v11 = vmov 0  }
 0x17c   : > { %v1220_v16 = vpop.f32.mrb[3].mxu0  ;;  %v380_v17 = vpack.c.bf16 %v371_v13, %v371_v13  ;;  %v378_v19 = vsub.f32 0.0, %v365_v14  ;;  %v381_v22 = vpack.c.bf16 %v376_v20, %v376_v20  ;;  %v377_v24 = vpack.c.bf16 %v366_v18, %v365_v14  ;;  %1374 = vset.pattern.permute.xlu1 %v1630_v11  ;;  %1375 = vset.pattern.permute.xlu0 %v1630_v11  ;;  %v1378_v20 = vld [vmem:[#allocation9] sm:$0xff]  }
 0x17e   : > { %403 = vrot.lane.b32.xlu1 %v380_v17, %s1624_s15  ;;  %v379_v21 = vpack.c.bf16 %v378_v19, %v366_v18 }
 0x180   : > { %396 = vrot.lane.b32.xlu0 %v379_v21, %s1625_s6 }
 0x182   : > { %406 = vrot.lane.b32.xlu1 %v381_v22, %s1626_s30 }
 0x184   : > { %538 = vrot.lane.b32.xlu0 %v381_v22, %s1624_s15  ;;  %s1540_s15 = sshll.u32 %s1637_s25, 4  ;;  %s1541_s15 = int_to_ptr.vmem [resolvable:$false] %s1540_s15 }
 0x185   : > { %p1543_p12 = scmp.lt.s32.totalorder %s2004_s26, %s1541_s15 }
 0x186   : > { %536 = vrot.lane.b32.xlu1 %v380_v17, %s1627_s27 }
 0x188   : > { %460 = vrot.lane.b32.xlu0 %v382_v23, %s1628_s8 }
 0x18a   : > { %531 = vrot.lane.b32.xlu1 %v377_v24, %s1626_s30 }
 0x18e   : > { %591 = vrot.lane.b32.xlu1 %v382_v23, %s1629_s12 }
 0x1f0   : > { %v404_v25 = vpop.permute.xlu1 %403 }
 0x1f2   : > { %v397_v26 = vpop.permute.xlu0 %396 }
 0x1f3   : > { %v401_v35 = vsel %vm398_vm2, %v377_v24, %v397_v26 }
 0x1f4   : > { %v407_v27 = vpop.permute.xlu1 %406 }
 0x1f5   : > { %v410_v28 = vsel %vm398_vm2, %v404_v25, %v407_v27 }
 0x1f6   : > { %v539_v29 = vpop.permute.xlu0 %538  ;;  %v413_v30 = vsel %vm317_vm1, %v410_v28, 0 }
 0x1f7   : > { %1222 = vmatpush3.bf16.xpose.msra.mxu1 %v413_v30 }
 0x1f8   : > { %v537_v31 = vpop.permute.xlu1 %536  ;;  %1233 = vmatprep.subr.bf16.mxu1 %v1621_v0 }
 0x1f9   : > { %v542_v33 = vsel %vm398_vm2, %v537_v31, %v539_v29 }
 0x1fa   : > { %v461_v32 = vpop.permute.xlu0 %460  ;;  %v545_v36 = vsel %vm317_vm1, %v542_v33, 0  ;;  %v1380_v33 = vld [vmem:[#allocation11] sm:$0xff]  }
 0x1fb   : > { %v468_v34 = vsel %vm466_vm3, %v461_v32, 0 }
 0x1fc   : > { %1228 = vmatpush3.bf16.msra.mxu0 %v468_v34  ;;  %v532_v37 = vpop.permute.xlu1 %531  ;;  %v1381_v34 = vld [vmem:[#allocation11 + $0x8] sm:$0xff]  }
 0x1fd   : > { %1239 = vmatprep.subr.bf16.mxu0 %v1621_v0  ;;  %v535_v38 = vsel %vm398_vm2, %v532_v37, %v379_v21  ;;  %v1379_v21 = vld [vmem:[#allocation9 + $0x8] sm:$0xff]  }
 0x1fe   : > { %1224 = vmatmul.mubr.msk.bf16.vlgmr.msra.gmra.mrb[0].mxu1 %vm317_vm1, %v401_v35 }
 0x1ff   : > { %1234 = vmatpush3.bf16.xpose.msra.mxu1 %v545_v36  ;;  %1235 = vmatprep.mubr.msk.bf16.mxu1 %vm1622_vm0, %v1621_v0 }
 0x200   : > { %1245 = vmatprep.subr.bf16.mxu1 %v1621_v0  ;;  %v592_v45 = vpop.permute.xlu1 %591 }
 0x201   : > { %v597_v50 = vsel %vm466_vm3, %v592_v45, 0 }
 0x206   : > { %1236 = vmatmul.mubr.msk.bf16.vlgmr.msra.gmra.mrb[4].mxu1 %vm317_vm1, %v535_v38 }
 0x207   : > { %1249 = vmatprep.mubr.msk.bf16.mxu1 %vm1622_vm0, %v1621_v0  ;;  %1246 = vmatpush3.bf16.msra.mxu1 %v1378_v20 }
 0x208   : > { %1247 = vmatprep.subr.bf16.mxu1 %v1621_v0 }
 0x20b   : > { %1248 = vmatpush3.bf16.msra.mxu1 %v1379_v21 }
 0x2d1   : > { %v449_v42 = vpop.f32.mrb[0].mxu1 }
 0x2d2   : > { %v1225_v43 = vpop.f32.mrb[1].mxu1  ;;  %v456_v46 = vsel %vm393_vm4, %v449_v42, 0.0 }
 0x2d3   : > { %v452_v44 = vpop.f32.mrb[2].mxu1 }
 0x2d4   : > { %v457_v47 = vsel %vm393_vm4, %v452_v44, 0.0  ;;  %v1226_v48 = vpop.f32.mrb[3].mxu1 }
 0x2d5   : > { %v458_v49 = vpack.c.bf16 %v457_v47, %v456_v46 }
 0x2d7   : > { %1230 = vmatmul.mubr.msk.bf16.vlgmr.msra.gmra.mrb[4].mxu0 %vm462_vm5, %v458_v49  ;;  %v1631_v49 = vmov 683565275  }
 0x2d8   : > { %1240 = vmatpush3.bf16.msra.mxu0 %v597_v50  ;;  %1241 = vmatprep.mubr.msk.bf16.mxu0 %vm1622_vm0, %v1621_v0 }
 0x2d9   : > { %v581_v51 = vpop.f32.mrb[4].mxu1  ;;  %1253 = vmatprep.subr.bf16.mxu0 %v1621_v0 }
 0x2da   : > { %v1237_v52 = vpop.f32.mrb[5].mxu1  ;;  %v588_v54 = vsel %vm393_vm4, %v581_v51, 0.0  ;;  %v1632_v51 = vmov 2475754826  }
 0x2db   : > { %v584_v53 = vpop.f32.mrb[6].mxu1 }
 0x2dc   : > { %v589_v55 = vsel %vm393_vm4, %v584_v53, 0.0  ;;  %v1238_v56 = vpop.f32.mrb[7].mxu1 }
 0x2dd   : > { %v590_v57 = vpack.c.bf16 %v589_v55, %v588_v54  ;;  %v1633_v54 = vmov 2131351028  }
 0x2df   : > { %1242 = vmatmul.mubr.msk.bf16.vlgmr.msra.gmra.mrb[8].mxu0 %vm462_vm5, %v590_v57  ;;  %v1634_v57 = vmov 2102212464  }
 0x2e0   : > { %1257 = vmatprep.mubr.msk.bf16.mxu0 %vm1622_vm0, %v1621_v0  ;;  %1254 = vmatpush3.bf16.msra.mxu0 %v1380_v33 }
 0x2e1   : > { %1255 = vmatprep.subr.bf16.mxu0 %v1621_v0 }
 0x2e4   : > { %1256 = vmatpush3.bf16.msra.mxu0 %v1381_v34 }
 0x3aa   : > { %v504_v58 = vpop.f32.mrb[4].mxu0 }
 0x3ab   : > { %v1231_v59 = vpop.f32.mrb[5].mxu0  ;;  %v511_v3 = vmul.f32 %v504_v58, %v504_v58 }
 0x3ac   : > { %v507_v60 = vpop.f32.mrb[6].mxu0 }
 0x3ad   : > { %v1232_v61 = vpop.f32.mrb[7].mxu0  ;;  %v512_v8 = vmul.f32 %v507_v60, %v507_v60  ;;  %v513_v9 = vsel %vm398_vm2, %v511_v3, 0.0 }
 0x3af   : > { %v516_v10 = vsel %vm398_vm2, %v512_v8, 0.0 }
 0x3b2   : > { %v633_v62 = vpop.f32.mrb[8].mxu0 }
 0x3b3   : > { %v640_v63 = vmul.f32 %v633_v62, %v633_v62  ;;  %v1243_v1 = vpop.f32.mrb[9].mxu0 }
 0x3b4   : > { %v636_v2 = vpop.f32.mrb[10].mxu0 }
 0x3b5   : > { %v641_v4 = vmul.f32 %v636_v2, %v636_v2  ;;  %v1244_v5 = vpop.f32.mrb[11].mxu0  ;;  %v642_v6 = vsel %vm398_vm2, %v640_v63, 0.0  ;;  %v1636_v63 = vmov 1326507024  }
 0x3b6   : > { %643 = vadd.xlane.f32.xlu0 %v642_v6 }
 0x3b7   : > { %v645_v7 = vsel %vm398_vm2, %v641_v4, 0.0 }
 0x3b8   : > { %646 = vadd.xlane.f32.xlu1 %v645_v7 }
 0x3ba   : > { %514 = vadd.xlane.f32.xlu0 %v513_v9 }
 0x3be   : > { %517 = vadd.xlane.f32.xlu0 %v516_v10 }
 0x443   : > { %v644_v12 = vpop.xlane.xlu0 %643 }
 0x445   : > { %v647_v13 = vpop.xlane.xlu1 %646 }
 0x446   : > { %v648_v14 = vadd.f32 %v647_v13, %v644_v12 }
 0x447   : > { %v515_v15 = vpop.xlane.xlu0 %514 }
 0x448   : > { %1382 = vrsqrt.f32 %v648_v14 }
 0x44b   : > { %v518_v16 = vpop.xlane.xlu0 %517 }
 0x44c   : > { %v519_v17 = vadd.f32 %v518_v16, %v515_v15 }
 0x44e   : > { %1384 = vrsqrt.f32 %v519_v17 }
 0x452   : > { %v1383_v18 = vpop.eup %1382 }
 0x453   : > { %652 = vperm.xlu1 %1374, %v1383_v18  }
 0x458   : > { %v1385_v19 = vpop.eup %1384 }
 0x459   : > { %523 = vperm.xlu0 %1375, %v1385_v19  }
 0x4d2   : > { %v653_v22 = vpop.permute.xlu1 %652 }
 0x4d3   : > { %v655_v23 = vmul.f32 %v653_v22, %v633_v62  ;;  %v656_v24 = vmul.f32 %v653_v22, %v636_v2 }
 0x4d5   : > { %659 = vrot.lane.b32.xlu1 %v655_v23, %s1625_s6 }
 0x4d8   : > { %v524_v25 = vpop.permute.xlu0 %523 }
 0x4d9   : > { %v526_v26 = vmul.f32 %v524_v25, %v504_v58  ;;  %v527_v27 = vmul.f32 %v524_v25, %v507_v60  ;;  %661 = vrot.lane.b32.xlu1 %v656_v24, %s1625_s6  ;;  %v1635_v60 = vmov 920167782   ;;  %s1542_s6 = scalar_lea.vmem %s1541_s15, 512 }
 0x4da   : > { %p1544_p3 = scmp.lt.s32.totalorder %s1542_s6, %s1536_s24 }
 0x4db   : > { %528 = vst.msk [vmem:[#allocation2] sm:$0xff] %vm398_vm2, %v526_v26  ;;  %529 = vst.msk [vmem:[#allocation2 + $0x8] sm:$0xff] %vm398_vm2, %v527_v27 }
 0x4dc   : > { %p1545_p13 = por %p1544_p3, %p1543_p12 }
 0x4de   : > { %p1546_p0 = pnand %p1545_p13, %p1539_p9 }
 0x547   : > { %v660_v28 = vpop.permute.xlu1 %659 }
 0x548   : > { %666 = vst.msk [vmem:[#allocation2] sm:$0xff] %vm665_vm6, %v660_v28 }
 0x54b   : > { %v662_v29 = vpop.permute.xlu1 %661 }
 0x54c   : > { %667 = vst.msk [vmem:[#allocation2 + $0x8] sm:$0xff] %vm665_vm6, %v662_v29 }
 0x54f   : > { %v1958_v30 = vld [vmem:[#allocation2] sm:$0xff] }
 0x553   : > { %v1960_v31 = vld [vmem:[#allocation2 + $0x8] sm:$0xff] }
 0x554   : > { %v670_v32 = vpack.c.bf16 %v1960_v31, %v1958_v30 }
 0x556   : > { %1250 = vmatmul.mubr.msk.bf16.vlgmr.msra.gmra.mrb[8].mxu1 %vm317_vm1, %v670_v32 }
 0x629   : > { %v1966_v35 = vpop.f32.mrb[8].mxu1 }
 0x62a   : > { %v1251_v36 = vpop.f32.mrb[9].mxu1 }
 0x62b   : > { %v1968_v37 = vpop.f32.mrb[10].mxu1 }
 0x62c   : > { %v1971_v38 = vmul.f32 2.0, %v1968_v37  ;;  %v1252_v39 = vpop.f32.mrb[11].mxu1 }
 0x62e   : > { %v738_v40 = vand.u32 2139095040, %v1971_v38  ;;  %v735_v44 = vand.u32 2147483647, %v1971_v38  ;;  %vm737_vm14 = vcmp.lt.s32.totalorder %v1971_v38, 0 }
 0x630   : > { %v739_v41 = vshrl.u32 %v738_v40, 23  ;;  %v742_v46 = vand.u32 8388607, %v735_v44  ;;  %vm736_vm15 = vcmp.le.f32.partialorder %v735_v44, 0.7853982 }
 0x632   : > { %v1179_v42 = vadd.s32 4294967169, %v739_v41  ;;  %v743_v2 = vor.u32 8388608, %v742_v46 }
 0x634   : > { %v745_v43 = vadd.s32 1, %v1179_v42  ;;  %v783_v16 = vshll.u32 %v743_v2, 8 }
 0x636   : > { %vm746_vm7 = vcmp.gt.s32.totalorder %v745_v43, 0 }
 0x637   : > { %v747_v0 = vsel %vm746_vm7, %v745_v43, 0  ;;  %vm827_vm7 = vweird.f32 %v1971_v38 }
 0x638   : > { %v749_v45 = vand.u32 31, %v747_v0  ;;  %v748_v48 = vshrl.u32 %v747_v0, 5 }
 0x63a   : > { %v750_v47 = vsub.s32 32, %v749_v45  ;;  %v752_v50 = vshll.u32 %v1631_v49, %v749_v45  ;;  %v755_v52 = vshll.u32 %v1632_v51, %v749_v45  ;;  %v758_v56 = vshll.u32 %v1633_v54, %v749_v45 }
 0x63b   : > { %v761_v59 = vshll.u32 %v1634_v57, %v749_v45  ;;  %v764_v62 = vshll.u32 %v1635_v60, %v749_v45  ;;  %vm767_vm8 = vcmp.lt.s32.totalorder %v748_v48, 1  ;;  %vm770_vm9 = vcmp.lt.s32.totalorder %v748_v48, 4 }
 0x63c   : > { %v753_v53 = vshrl.u32 %v1632_v51, %v750_v47  ;;  %v756_v55 = vshrl.u32 %v1633_v54, %v750_v47  ;;  %v759_v58 = vshrl.u32 %v1634_v57, %v750_v47  ;;  %v762_v61 = vshrl.u32 %v1635_v60, %v750_v47 }
 0x63d   : > { %v765_v1 = vshrl.u32 %v1636_v63, %v750_v47  ;;  %v751_v11 = vshrl.u32 %v1631_v49, %v750_v47  ;;  %vm769_vm10 = vcmp.lt.s32.totalorder %v748_v48, 3  ;;  %vm768_vm11 = vcmp.lt.s32.totalorder %v748_v48, 2 }
 0x63e   : > { %v754_v3 = vor.u32 %v753_v53, %v752_v50  ;;  %v757_v4 = vor.u32 %v756_v55, %v755_v52  ;;  %v760_v5 = vor.u32 %v759_v58, %v758_v56  ;;  %v763_v6 = vor.u32 %v762_v61, %v761_v59 }
 0x63f   : > { %v766_v7 = vor.u32 %v765_v1, %v764_v62  ;;  %v731_v55 = vmul.f32 -2.0, %v1966_v35 }
 0x640   : > { %v772_v8 = vsel %vm770_vm9, %v760_v5, 2102212464  ;;  %v775_v9 = vsel %vm767_vm8, %v754_v3, %v757_v4  ;;  %v779_v10 = vsel %vm767_vm8, %v757_v4, %v760_v5  ;;  %v776_v12 = vsel %vm770_vm9, %v763_v6, 920167782 }
 0x641   : > { %v780_v13 = vsel %vm770_vm9, %v766_v7, 1326507024  ;;  %v777_v14 = vsel %vm769_vm10, %v760_v5, %v776_v12  ;;  %v771_v17 = vsel %vm767_vm8, %v751_v11, %v754_v3  ;;  %v773_v18 = vsel %vm769_vm10, %v757_v4, %v772_v8 }
 0x642   : > { %v781_v15 = vsel %vm769_vm10, %v763_v6, %v780_v13  ;;  %v778_v19 = vsel %vm768_vm11, %v775_v9, %v777_v14  ;;  %v774_v25 = vsel %vm768_vm11, %v771_v17, %v773_v18  ;;  %v732_v59 = vmul.f32 1.442695, %v731_v55 }
 0x643   : > { %v782_v20 = vsel %vm768_vm11, %v779_v10, %v781_v15  ;;  %v1980_v23 = vmul.u32.u64.low %v783_v16, %v778_v19  ;;  %v1981_v24 = vmul.u32.u64.high %v783_v16, %v778_v19, %v1980_v23  ;;  %v790_v27 = vmul.u32 %v783_v16, %v774_v25 }
 0x644   : > { %v1977_v21 = vmul.u32.u64.low %v783_v16, %v782_v20  ;;  %v1978_v22 = vmul.u32.u64.high %v783_v16, %v782_v20, %v1977_v21 }
 0x645   : > { %v793_v26 = vadd.s32 1, %v1981_v24 }
 0x646   : > { %vm792_vm12 = vc.u32 %v1978_v22, %v1980_v23  ;;  %v791_v0 = vadd.s32 %v1980_v23, %v1978_v22 }
 0x647   : > { %v794_v28 = vsel %vm792_vm12, %v793_v26, %v1981_v24 }
 0x648   : > { %v795_v29 = vadd.s32 %v794_v28, %v790_v27 }
 0x64a   : > { %v796_v32 = vadd.s32 536870912, %v795_v29 }
 0x64c   : > { %v797_v33 = vshrl.u32 %v796_v32, 30 }
 0x64e   : > { %v798_v34 = vshll.u32 %v797_v33, 30  ;;  %v821_v57 = vsub.s32 4, %v797_v33 }
 0x650   : > { %v799_v36 = vsub.s32 %v795_v29, %v798_v34  ;;  %v822_v61 = vsel %vm737_vm14, %v821_v57, %v797_v33 }
 0x651   : > { %v824_v63 = vsel %vm736_vm15, 0, %v822_v61 }
 0x652   : > { %v801_v39 = vsub.s32 0, %v799_v36  ;;  %v934_v1 = vadd.s32 3, %v824_v63  ;;  %v828_v2 = vand.u32 3, %v824_v63 }
 0x654   : > { %v1180_v40 = vmin.u32 %v801_v39, %v799_v36  ;;  %v935_v3 = vand.u32 3, %v934_v1  ;;  %vm833_vm0 = vcmp.eq.s32.totalorder %v828_v2, 2  ;;  %vm830_vm3 = vcmp.eq.s32.totalorder %v828_v2, 0 }
 0x655   : > { %vm829_vm5 = vcmp.lt.s32.totalorder %v828_v2, 2 }
 0x656   : > { %v803_v41 = vclz %v1180_v40  ;;  %vm940_vm2 = vcmp.eq.s32.totalorder %v935_v3, 2  ;;  %vm937_vm4 = vcmp.eq.s32.totalorder %v935_v3, 0  ;;  %vm936_vm6 = vcmp.lt.s32.totalorder %v935_v3, 2 }
 0x658   : > { %v1181_v42 = vadd.s32 4294967294, %v803_v41 }
 0x65a   : > { %vm1182_vm13 = vcmp.lt.s32.totalorder %v1181_v42, 0 }
 0x65b   : > { %v806_v43 = vsel %vm1182_vm13, 0, %v1181_v42 }
 0x65c   : > { %v807_v45 = vsub.s32 32, %v806_v43  ;;  %v811_v46 = vsub.s32 4294967266, %v806_v43  ;;  %v808_v47 = vshll.u32 %v799_v36, %v806_v43 }
 0x65e   : > { %v809_v48 = vshrl.u32 %v791_v0, %v807_v45  ;;  %v812_v49 = vadd.s32 127, %v811_v46 }
 0x660   : > { %v810_v50 = vor.u32 %v809_v48, %v808_v47  ;;  %v813_v51 = vshll.u32 %v812_v49, 23 }
 0x662   : > { %v814_v52 = vor.u32 4788187, %v813_v51  ;;  %v817_v54 = vcvt.s32.f32 %v810_v50 }
 0x664   : > { %v815_v53 = vand.u32 2147483647, %v814_v52 }
 0x666   : > { %v818_v56 = vmul.f32 %v817_v54, %v815_v53 }
 0x668   : > { %v819_v58 = vxor.u32 2147483648, %v818_v56 }
 0x66a   : > { %v820_v60 = vsel %vm737_vm14, %v819_v58, %v818_v56 }
 0x66b   : > { %v823_v62 = vsel %vm736_vm15, %v1971_v38, %v820_v60 }
 0x66c   : > { %1386 = vcosq.f32 %v823_v62 }
 0x66d   : > { %1388 = vsinq.f32 %v823_v62 }
 0x66e   : > { %1390 = vpow2.f32 %v732_v59 }
 0x676   : > { %v1387_v4 = vpop.eup %1386 }
 0x677   : > { %v1389_v5 = vpop.eup %1388  ;;  %v834_v6 = vxor.u32 2147483648, %v1387_v4 }
 0x678   : > { %v1391_v7 = vpop.eup %1390  ;;  %v831_v8 = vxor.u32 2147483648, %v1389_v5 }
 0x679   : > { %v835_v44 = vsel %vm833_vm0, %v834_v6, %v1389_v5  ;;  %v942_v9 = vsel %vm940_vm2, %v834_v6, %v1389_v5  ;;  %v840_v13 = vsub.f32 0.0, %v1391_v7 }
 0x67a   : > { %v832_v10 = vsel %vm830_vm3, %v1387_v4, %v831_v8  ;;  %v939_v11 = vsel %vm937_vm4, %v1387_v4, %v831_v8 }
 0x67b   : > { %v836_v12 = vsel %vm829_vm5, %v832_v10, %v835_v44  ;;  %v943_v14 = vsel %vm936_vm6, %v939_v11, %v942_v9 }
 0x67c   : > { %v837_v15 = vsel %vm827_vm7, nan, %v836_v12  ;;  %v944_v16 = vsel %vm827_vm7, nan, %v943_v14 }
 0x67d   : > { %v838_v17 = vmul.f32 %v1391_v7, %v837_v15  ;;  %v945_v18 = vmul.f32 %v944_v16, %v840_v13 }
 0x67f   : > { %v839_v19 = vadd.f32 1.0, %v838_v17  ;;  %v951_v20 = vmul.f32 %v945_v18, %v1968_v37  ;;  %v955_v21 = vmul.f32 %v945_v18, %v1966_v35  ;;  %v947_v23 = vmul.f32 %v945_v18, %v945_v18 }
 0x681   : > { %v946_v22 = vmul.f32 %v839_v19, %v839_v19  ;;  %v950_v24 = vmul.f32 %v839_v19, %v1966_v35  ;;  %v954_v25 = vmul.f32 %v839_v19, %v1968_v37 }
 0x683   : > { %v948_v38 = vadd.f32 %v947_v23, %v946_v22  ;;  %v952_v26 = vadd.f32 %v951_v20, %v950_v24  ;;  %v956_v27 = vsub.f32 %v954_v25, %v955_v21 }
 0x685   : > { %1392 = vrcp.f32 %v948_v38 }
 0x68f   : > { %v1393_v28 = vpop.eup %1392 }
 0x690   : > { %v953_v29 = vmul.f32 %v1393_v28, %v952_v26  ;;  %v957_v32 = vmul.f32 %v1393_v28, %v956_v27 }
 0x692   : > { %v958_v33 = vmul.f32 %v953_v29, %v1958_v30  ;;  %v959_v34 = vmul.f32 %v957_v32, %v1960_v31  ;;  %v961_v36 = vmul.f32 %v957_v32, %v1958_v30  ;;  %v962_v39 = vmul.f32 %v953_v29, %v1960_v31 }
 0x694   : > { %v960_v35 = vsub.f32 %v958_v33, %v959_v34  ;;  %v963_v37 = vadd.f32 %v962_v39, %v961_v36 }
 0x696   : > { %v964_v40 = vpack.c.bf16 %v963_v37, %v960_v35 }
 0x698   : > { %1258 = vmatmul.mubr.msk.bf16.vlgmr.msra.gmra.mrb[12].mxu0 %vm317_vm1, %v964_v40 }
 0x76b   : > { %v1018_v41 = vpop.f32.mrb[12].mxu0 }
 0x76c   : > { %1025 = vst.msk [vmem:[%s297_s16] sm:$0xff] %vm317_vm1, %v1018_v41  ;;  %v1259_v30 = vpop.f32.mrb[13].mxu0 }
 0x76d   : > { %v1021_v31 = vpop.f32.mrb[14].mxu0 }
 0x76e   : > { %1026 = vst.msk [vmem:[%s297_s16 + $0x8] sm:$0xff] %vm317_vm1, %v1021_v31  ;;  %v1260_v42 = vpop.f32.mrb[15].mxu0 }
 0x76f   : > { %1549 = shalt.err (!%p1546_p0)
}
 0x770   : > { %s1550_s30 = scalar_lea.hbm %s2009_s10, 256  ;;  %s1554_s12 = scalar_lea.hbm %s2060_s5, 512 }
 0x771   : > { %p1551_p2 = scmp.ne.s32.totalorder %s2009_s10, %s1550_s30  ;;  %p1555_p10 = scmp.lt.u32.totalorder %s2009_s10, %s2060_s5 }
 0x772   : > { %p1556_p11 = scmp.lt.u32.totalorder %s1554_s12, %s1550_s30  ;;  %p1558_p6 = scmp.lt.u32.totalorder %s1550_s30, %s2009_s10 }
 0x773   : > { %p1552_p8 = pnand %p1551_p2, %p2078_p5 }
 0x774   : > { %p1557_p1 = por %p1556_p11, %p1555_p10 }
 0x775   : > { %p1553_p4 = pneg %p1552_p8 }
 0x776   : > { %p1559_p7 = por %p1558_p6, %p1557_p1 }
 0x778   : > { %p1560_p9 = pnand %p1559_p7, %p1553_p4 }
 0x77a   : > { %1563 = shalt.err (!%p1560_p9)
}
 0x77b   : > { %s1638_s29 = smov 128   ;;  %s1639_s7 = smov 8  }
 0x77c   : > { %1283 = dma.vmem_to_hbm [thread:$0]  (%p2078_p5), %s2004_s26, 256, %s2009_s10, %s1028_s17, %s1638_s29, %s1638_s29, %s1639_s7  }
 0x77d PF: > { %s1056_s9 = sand.u32 1, %s1598_s18   ;;  %p2079_p12 = scmp.ne.s32.totalorder %s2071_s14, 0 }
 0x77e   : > { %p2080_p3 = scmp.ge.s32.totalorder %s1610_s21, 2  ;;  %s1057_s24 = scalar_lea.sflag [#allocation5], %s1056_s9 }
 0x780   : > { %p1303_p13 = pnand %p2080_p3, %p2079_p12 }
 0x782   : > { %1593 = dma.done.wait (!%p1303_p13), %s1057_s24, 256  }
 0x783   : > { %1595 = vsyncadd (!%p1303_p13), %s1057_s24, 4294967040  ;;  %p20_p0 = scmp.ge.s32.totalorder %s1819_s11, 4   ;;  %s2081_s18 = smov %s1602_s19 }
 0x784   : > { %s2082_s19 = smov %s1606_s20  ;;  %s2083_s20 = smov %s1830_s23 }
 0x785   : > { %s2084_s21 = smov %s1819_s11  ;;  %22 = sbr.rel (!%p20_p0) target bundleno = 7 (0x7), region = 101 }
 0x78c   :  { %1062 = vsyncpa [#allocation4], 1 }
 0x78d   :  { %1064 = vsyncpa [#allocation4 + $0x1], 1 }
 0x78e   :  { %1065 = vsyncpa [#allocation7], 1 }
 0x78f   :  { %1066 = vsyncpa [#allocation10], 1 }
 0x790   :  { %1067 = vsyncpa [#allocation5], 1 }
 0x791   :  { %1069 = vsyncpa [#allocation5 + $0x1], 1 }

</bundles_post_ra>
